<compile_context>
chip_gen: v7x
topology: tpu7x:2x2x1
jax: 0.10.0
libtpu: 0.0.40
codegen_flags: <defaults>
</compile_context>

<pallas_src>
import functools

import jax
import jax.numpy as jnp
from jax.experimental import pallas as pl
from jax.experimental.pallas import tpu as pltpu

LANE = 128  # TPU vreg lane width; batch tiles must be a multiple of this.


def _round_up(n, m):
    return ((n + m - 1) // m) * m


def dqn_kernel(x_ref, w1_ref, b1_ref, w2_ref, b2_ref, w3_ref, b3_ref, o_ref):
    """Feature-major MLP: all refs are (features, batch_tile); batch = lane axis."""
    x = x_ref[...]
    # fc1 + ReLU:  (hidden, in) @ (in, tm) -> (hidden, tm), f32 accumulation.
    h = jnp.dot(w1_ref[...], x, preferred_element_type=jnp.float32)
    h = jnp.maximum(h + b1_ref[...], 0.0).astype(w2_ref.dtype)
    # fc2 + ReLU
    h = jnp.dot(w2_ref[...], h, preferred_element_type=jnp.float32)
    h = jnp.maximum(h + b2_ref[...], 0.0).astype(w3_ref.dtype)
    # fc3 (no activation).  (out_size, tm) with tm % 128 == 0 is lane-dense:
    # a full unmasked store of only the real output bytes (no 4->128 padding).
    out = jnp.dot(w3_ref[...], h, preferred_element_type=jnp.float32)
    o_ref[...] = (out + b3_ref[...]).astype(o_ref.dtype)


@functools.partial(jax.jit, static_argnames=("block_m",))
def dqn_forward(x, params, *, block_m=1024):
    """x: (B, input_size) float32. params: kernel-ready dict from prepare_params().

    Returns (B, output_size) float32, matching PyTorch DQN.forward(x).
    """
    w1, b1, w2, b2, w3, b3 = (params["w1"], params["b1"], params["w2"],
                              params["b2"], params["w3"], params["b3"])
    B, in_size = x.shape
    out_size = w3.shape[0]

    assert block_m % LANE == 0, "block_m must be a multiple of 128 (lane width)"
    # Batch tile: as large as block_m allows (amortises per-step overhead);
    # small batches collapse to a single grid step.  On v7x, callers with small
    # batches may pass a smaller block_m to keep >= 2 "parallel" steps so both
    # TensorCores get work.
    tm = min(block_m, _round_up(B, LANE))
    b_pad = _round_up(B, tm)

    # Feature-major input (in_size, b_pad): cast once, pad batch, transpose.
    # Padded batch columns produce ReLU(bias)-derived junk that is sliced off.
    xt = jnp.pad(x.astype(w1.dtype), ((0, b_pad - B), (0, 0))).T

    grid = (b_pad // tm,)

    def resident(a):  # same block every grid step -> stays VMEM-resident
        return pl.BlockSpec(a.shape, lambda i: (0,) * a.ndim)

    out_t = pl.pallas_call(
        dqn_kernel,
        out_shape=jax.ShapeDtypeStruct((out_size, b_pad), jnp.float32),
        grid_spec=pltpu.PrefetchScalarGridSpec(
            num_scalar_prefetch=0,
            grid=grid,
            in_specs=[
                pl.BlockSpec((in_size, tm), lambda i: (0, i)),  # x: pipelined over batch
                resident(w1), resident(b1),
                resident(w2), resident(b2),
                resident(w3), resident(b3),
            ],
            out_specs=pl.BlockSpec((out_size, tm), lambda i: (0, i)),
        ),
        compiler_params=pltpu.CompilerParams(
            dimension_semantics=("parallel",),  # megacore sharding on v7x
        ),
    )(xt, w1, b1, w2, b2, w3, b3)

    # Back to the module's batch-major (B, out_size) layout (tiny array).
    return out_t[:, :B].T


def init_dqn_params(key, input_size, hidden_size, output_size):
    """PyTorch nn.Linear-style init: W (out, in), b (out,), uniform +-1/sqrt(fan_in)."""
    ks = jax.random.split(key, 6)

    def linear(kw, kb, fan_in, fan_out):
        bound = 1.0 / jnp.sqrt(fan_in)
        w = jax.random.uniform(kw, (fan_out, fan_in), jnp.float32, -bound, bound)
        b = jax.random.uniform(kb, (fan_out,), jnp.float32, -bound, bound)
        return w, b

    w1, b1 = linear(ks[0], ks[1], input_size, hidden_size)
    w2, b2 = linear(ks[2], ks[3], hidden_size, hidden_size)
    w3, b3 = linear(ks[4], ks[5], hidden_size, output_size)
    return {"w1": w1, "b1": b1, "w2": w2, "b2": b2, "w3": w3, "b3": b3}


def prepare_params(raw, compute_dtype=jnp.bfloat16):
    """One-time layout/dtype prep, hoisted out of the forward pass:
    weights keep the PyTorch (out, in) orientation (exactly what W @ x needs),
    cast once to the matmul dtype; biases become (out, 1) f32 columns that
    broadcast over the batch-lane axis inside the kernel."""
    return {
        "w1": raw["w1"].astype(compute_dtype),
        "b1": raw["b1"].reshape(-1, 1).astype(jnp.float32),
        "w2": raw["w2"].astype(compute_dtype),
        "b2": raw["b2"].reshape(-1, 1).astype(jnp.float32),
        "w3": raw["w3"].astype(compute_dtype),
        "b3": raw["b3"].reshape(-1, 1).astype(jnp.float32),
    }


def _reference(x, raw):
    """Plain-JAX forward, full-precision matmuls (matches the PyTorch module)."""
    dot = functools.partial(jnp.dot, precision=jax.lax.Precision.HIGHEST)
    h = jnp.maximum(dot(x, raw["w1"].T) + raw["b1"], 0.0)
    h = jnp.maximum(dot(h, raw["w2"].T) + raw["b2"], 0.0)
    return dot(h, raw["w3"].T) + raw["b3"]


if __name__ == "__main__":
    # Snake DQN shapes: 16-feature state, hidden 32, 4 actions; batch 256.
    batch, input_size, hidden_size, output_size = 256, 16, 32, 4

    key = jax.random.PRNGKey(0)
    kx, kp = jax.random.split(key)
    x = jax.random.normal(kx, (batch, input_size), jnp.float32)
    raw = init_dqn_params(kp, input_size, hidden_size, output_size)
    ref = _reference(x, raw)

    # Exact-math check: f32 compute path must match the plain-JAX reference.
    params_f32 = prepare_params(raw, compute_dtype=jnp.float32)
    out_f32 = jax.block_until_ready(dqn_forward(x, params_f32))
    assert out_f32.shape == (batch, output_size)
    assert jnp.allclose(out_f32, ref, atol=1e-5, rtol=1e-5)

    # Performance path: bf16 matmuls, f32 accumulation (looser tolerance).
    params_bf16 = prepare_params(raw, compute_dtype=jnp.bfloat16)
    out_bf16 = jax.block_until_ready(dqn_forward(x, params_bf16))
    assert out_bf16.shape == (batch, output_size)
    assert jnp.allclose(out_bf16, ref, atol=5e-2, rtol=5e-2)

    # Non-lane-aligned small batch exercises the padding / slicing path.
    x_small = x[:10]
    out_small = jax.block_until_ready(dqn_forward(x_small, params_f32))
    assert out_small.shape == (10, output_size)
    assert jnp.allclose(out_small, ref[:10], atol=1e-5, rtol=1e-5)

    print("KERNEL_OK")
</pallas_src>

<mosaic_0001>
module attributes {stable_mosaic.version = 11 : i64} {
  func.func @dqn_kernel(%arg0: i32, %arg1: memref<16x256xf32, #tpu.memory_space<vmem>>, %arg2: memref<32x16xf32, #tpu.memory_space<vmem>>, %arg3: memref<32x1xf32, #tpu.memory_space<vmem>>, %arg4: memref<32x32xf32, #tpu.memory_space<vmem>>, %arg5: memref<32x1xf32, #tpu.memory_space<vmem>>, %arg6: memref<4x32xf32, #tpu.memory_space<vmem>>, %arg7: memref<4x1xf32, #tpu.memory_space<vmem>>, %arg8: memref<4x256xf32, #tpu.memory_space<vmem>>) attributes {dimension_semantics = [#tpu.dimension_semantics<parallel>], iteration_bounds = array<i64: 1>, scalar_prefetch = 0 : i64, scratch_operands = 0 : i64, tpu.core_type = #tpu.core_type<tc>, window_params = [{transform_indices = @transform_0, window_bounds = array<i64: 16, 256>}, {pipeline_mode = #tpu.pipeline_mode<synchronous>, transform_indices = @transform_1, window_bounds = array<i64: 32, 16>}, {pipeline_mode = #tpu.pipeline_mode<synchronous>, transform_indices = @transform_2, window_bounds = array<i64: 32, 1>}, {pipeline_mode = #tpu.pipeline_mode<synchronous>, transform_indices = @transform_3, window_bounds = array<i64: 32, 32>}, {pipeline_mode = #tpu.pipeline_mode<synchronous>, transform_indices = @transform_4, window_bounds = array<i64: 32, 1>}, {pipeline_mode = #tpu.pipeline_mode<synchronous>, transform_indices = @transform_5, window_bounds = array<i64: 4, 32>}, {pipeline_mode = #tpu.pipeline_mode<synchronous>, transform_indices = @transform_6, window_bounds = array<i64: 4, 1>}, {transform_indices = @transform_7, window_bounds = array<i64: 4, 256>}]} {
    %c0 = arith.constant 0 : index
    %c0_0 = arith.constant 0 : index
    %0 = vector.load %arg1[%c0, %c0_0] : memref<16x256xf32, #tpu.memory_space<vmem>>, vector<16x256xf32>
    %c0_1 = arith.constant 0 : index
    %c0_2 = arith.constant 0 : index
    %1 = vector.load %arg2[%c0_1, %c0_2] : memref<32x16xf32, #tpu.memory_space<vmem>>, vector<32x16xf32>
    %cst = arith.constant dense<0.000000e+00> : vector<32x256xf32>
    %2 = tpu.matmul %1, %0, %cst {dimension_numbers = #tpu.dot_dimension_numbers<[1], [0], [0], [1], [0, 0, 1, 1], [], []>} : vector<32x16xf32>, vector<16x256xf32>, vector<32x256xf32> -> vector<32x256xf32>
    %c0_3 = arith.constant 0 : index
    %c0_4 = arith.constant 0 : index
    %3 = vector.load %arg3[%c0_3, %c0_4] : memref<32x1xf32, #tpu.memory_space<vmem>>, vector<32x1xf32>
    %4 = vector.broadcast %3 : vector<32x1xf32> to vector<32x256xf32>
    %5 = arith.addf %2, %4 : vector<32x256xf32>
    %cst_5 = arith.constant 0.000000e+00 : f32
    %6 = vector.broadcast %cst_5 : f32 to vector<32x256xf32>
    %7 = arith.maximumf %5, %6 : vector<32x256xf32>
    %c0_6 = arith.constant 0 : index
    %c0_7 = arith.constant 0 : index
    %8 = vector.load %arg4[%c0_6, %c0_7] : memref<32x32xf32, #tpu.memory_space<vmem>>, vector<32x32xf32>
    %cst_8 = arith.constant dense<0.000000e+00> : vector<32x256xf32>
    %9 = tpu.matmul %8, %7, %cst_8 {dimension_numbers = #tpu.dot_dimension_numbers<[1], [0], [0], [1], [0, 0, 1, 1], [], []>} : vector<32x32xf32>, vector<32x256xf32>, vector<32x256xf32> -> vector<32x256xf32>
    %c0_9 = arith.constant 0 : index
    %c0_10 = arith.constant 0 : index
    %10 = vector.load %arg5[%c0_9, %c0_10] : memref<32x1xf32, #tpu.memory_space<vmem>>, vector<32x1xf32>
    %11 = vector.broadcast %10 : vector<32x1xf32> to vector<32x256xf32>
    %12 = arith.addf %9, %11 : vector<32x256xf32>
    %cst_11 = arith.constant 0.000000e+00 : f32
    %13 = vector.broadcast %cst_11 : f32 to vector<32x256xf32>
    %14 = arith.maximumf %12, %13 : vector<32x256xf32>
    %c0_12 = arith.constant 0 : index
    %c0_13 = arith.constant 0 : index
    %15 = vector.load %arg6[%c0_12, %c0_13] : memref<4x32xf32, #tpu.memory_space<vmem>>, vector<4x32xf32>
    %cst_14 = arith.constant dense<0.000000e+00> : vector<4x256xf32>
    %16 = tpu.matmul %15, %14, %cst_14 {dimension_numbers = #tpu.dot_dimension_numbers<[1], [0], [0], [1], [0, 0, 1, 1], [], []>} : vector<4x32xf32>, vector<32x256xf32>, vector<4x256xf32> -> vector<4x256xf32>
    %c0_15 = arith.constant 0 : index
    %c0_16 = arith.constant 0 : index
    %17 = vector.load %arg7[%c0_15, %c0_16] : memref<4x1xf32, #tpu.memory_space<vmem>>, vector<4x1xf32>
    %18 = vector.broadcast %17 : vector<4x1xf32> to vector<4x256xf32>
    %19 = arith.addf %16, %18 : vector<4x256xf32>
    %c0_17 = arith.constant 0 : index
    %c0_18 = arith.constant 0 : index
    %20 = vector.load %arg8[%c0_17, %c0_18] : memref<4x256xf32, #tpu.memory_space<vmem>>, vector<4x256xf32>
    tpu.vector_store %arg8[%c0_17, %c0_18], %19 {strides = array<i32>} : memref<4x256xf32, #tpu.memory_space<vmem>>, vector<4x256xf32>,
    return
  }
  func.func @transform_0(%arg0: i32) -> (i32, i32) {
    %c0_i32 = arith.constant 0 : i32
    %c0_i32_0 = arith.constant 0 : i32
    return %c0_i32, %arg0 : i32, i32
  }
  func.func @transform_1(%arg0: i32) -> (i32, i32) {
    %c0_i32 = arith.constant 0 : i32
    %c0_i32_0 = arith.constant 0 : i32
    %c0_i32_1 = arith.constant 0 : i32
    return %c0_i32, %c0_i32_0 : i32, i32
  }
  func.func @transform_2(%arg0: i32) -> (i32, i32) {
    %c0_i32 = arith.constant 0 : i32
    %c0_i32_0 = arith.constant 0 : i32
    %c0_i32_1 = arith.constant 0 : i32
    return %c0_i32, %c0_i32_0 : i32, i32
  }
  func.func @transform_3(%arg0: i32) -> (i32, i32) {
    %c0_i32 = arith.constant 0 : i32
    %c0_i32_0 = arith.constant 0 : i32
    %c0_i32_1 = arith.constant 0 : i32
    return %c0_i32, %c0_i32_0 : i32, i32
  }
  func.func @transform_4(%arg0: i32) -> (i32, i32) {
    %c0_i32 = arith.constant 0 : i32
    %c0_i32_0 = arith.constant 0 : i32
    %c0_i32_1 = arith.constant 0 : i32
    return %c0_i32, %c0_i32_0 : i32, i32
  }
  func.func @transform_5(%arg0: i32) -> (i32, i32) {
    %c0_i32 = arith.constant 0 : i32
    %c0_i32_0 = arith.constant 0 : i32
    %c0_i32_1 = arith.constant 0 : i32
    return %c0_i32, %c0_i32_0 : i32, i32
  }
  func.func @transform_6(%arg0: i32) -> (i32, i32) {
    %c0_i32 = arith.constant 0 : i32
    %c0_i32_0 = arith.constant 0 : i32
    %c0_i32_1 = arith.constant 0 : i32
    return %c0_i32, %c0_i32_0 : i32, i32
  }
  func.func @transform_7(%arg0: i32) -> (i32, i32) {
    %c0_i32 = arith.constant 0 : i32
    %c0_i32_0 = arith.constant 0 : i32
    return %c0_i32, %arg0 : i32, i32
  }
}

</mosaic_0001>

<bundles_post_ra>
// kernel: dqn_forward.1
= control target key start
LH: loop header
LB: loop body
LE: loop exit
PB: predicated region body
PF: predicated region fallthrough
CT: control target
= control target key end

     0   :  { %v465_v5 = vmov 0.0   ;;  %v466_v6 = vmov 0   ;;  %vm59_vm0 = vcmask 130048   ;;  %s604_s0 = inlined_call_operand.vmem [shape: f32[16,256], index: 0, kind: input, shape index: {}]   ;;  %s605_s1 = inlined_call_operand.vmem [shape: f32[32,16], index: 1, kind: input, shape index: {}]   ;;  %s606_s2 = inlined_call_operand.vmem [shape: f32[32,1], index: 2, kind: input, shape index: {}]   ;;  %s607_s3 = inlined_call_operand.vmem [shape: f32[32,32], index: 3, kind: input, shape index: {}]   ;;  %s608_s4 = inlined_call_operand.vmem [shape: f32[32,1], index: 4, kind: input, shape index: {}]   ;;  %s609_s5 = inlined_call_operand.vmem [shape: f32[4,32], index: 5, kind: input, shape index: {}]   ;;  %s610_s6 = inlined_call_operand.vmem [shape: f32[4,1], index: 6, kind: input, shape index: {}]   ;;  %s611_s7 = inlined_call_operand.hbm [shape: f32[4,256], index: 7, kind: output, shape index: {}]  }
   0x1   :  { %v28_v0 = vld [vmem:[%s604_s0 + $0x8] sm:$0xff]  ;;  %v30_v1 = vld [vmem:[%s604_s0 + $0x18] sm:$0xff]  ;;  %v27_v2 = vld [vmem:[%s604_s0] sm:$0xff]  ;;  %136 = vmatprep.mubr.f32.mxu0 %v465_v5  ;;  %439 = vset.pattern.permute.xlu0 %v466_v6 }
   0x2   :  { %v416_v3 = vpack.c.bf16 %v30_v1, %v28_v0  ;;  %v29_v4 = vld [vmem:[%s604_s0 + $0x10] sm:$0xff]  ;;  %v35_v8 = vld [vmem:[%s606_s2] sm:$0xff]  ;;  %440 = vset.pattern.permute.xlu1 %v466_v6  ;;  %274 = vmatprep.mubr.f32.mxu1 %v465_v5  ;;  %v36_v11 = vld [vmem:[%s606_s2 + $0x8] sm:$0xff] }
   0x3   :  { %v418_v7 = vpack.c.bf16 %v29_v4, %v27_v2  ;;  %41 = vperm.xlu0 %439, %v35_v8   ;;  %v37_v9 = vld [vmem:[%s606_s2 + $0x10] sm:$0xff]  ;;  %v31_v10 = vld [vmem:[%s605_s1] sm:$0xff]  ;;  %v38_v12 = vld [vmem:[%s606_s2 + $0x18] sm:$0xff] }
   0x4   :  { %417 = vmatprep.subr.bf16.mxu0 %v416_v3  ;;  %51 = vperm.xlu1 %440, %v37_v9  }
   0x5   :  { %419 = vmatpush1.bf16.msra.mxu0 %v418_v7 }
   0x6   :  { %12 = vsyncpa [#allocation3], 0  ;;  %v32_v13 = vld [vmem:[%s605_s1 + $0x8] sm:$0xff]  ;;  %v173_v14 = vld [vmem:[%s608_s4] sm:$0xff]  ;;  %vm197_vm1 = vcmask 261120   ;;  %s467_s15 = smov [#allocation2]  }
   0x7   :  { %46 = vperm.xlu0 %439, %v36_v11   ;;  %v174_v15 = vld [vmem:[%s608_s4 + $0x8] sm:$0xff]  ;;  %v33_v16 = vld [vmem:[%s605_s1 + $0x10] sm:$0xff]  ;;  %v176_v18 = vld [vmem:[%s608_s4 + $0x18] sm:$0xff]  ;;  %s399_s16 = sshll.u32 %s467_s15, 4  ;;  %s400_s16 = int_to_ptr.vmem [resolvable:$true] %s399_s16 }
   0x8   :  { %407 = vmatmul.mubr.msk.f32.vlgmr.msra.gmra.mrb[0].mxu0 %vm59_vm0, %v31_v10  ;;  %56 = vperm.xlu1 %440, %v38_v12   ;;  %v175_v17 = vld [vmem:[%s608_s4 + $0x10] sm:$0xff]  ;;  %v34_v19 = vld [vmem:[%s605_s1 + $0x18] sm:$0xff]  ;;  %v308_v20 = vld [vmem:[%s610_s6] sm:$0xf]  ;;  %s441_s17 = scalar_lea.vmem %s400_s16, 128  ;;  %p446_p1 = scmp.lt.s32.totalorder %s400_s16, %s400_s16 }
   0x9   :  { %142 = vmatprep.mubr.f32.mxu0 %v465_v5  ;;  %v169_v53 = vld [vmem:[%s607_s3] sm:$0xff]  ;;  %v170_v54 = vld [vmem:[%s607_s3 + $0x8] sm:$0xff]  ;;  %v171_v55 = vld [vmem:[%s607_s3 + $0x10] sm:$0xff]  ;;  %p442_p0 = scmp.ne.s32.totalorder %s400_s16, %s441_s17  ;;  %p447_p2 = scmp.lt.s32.totalorder %s441_s17, %s441_s17 }
   0xa   :  { %v172_v56 = vld [vmem:[%s607_s3 + $0x18] sm:$0xff] }
   0xb   :  { %179 = vperm.xlu0 %439, %v173_v14   ;;  %p448_p3 = por %p447_p2, %p446_p1 }
   0xc   :  { %408 = vmatmul.mubr.msk.f32.gmra.mrb[2].mxu0 %vm59_vm0, %v32_v13  ;;  %184 = vperm.xlu1 %440, %v174_v15  }
   0xd   :  { %148 = vmatprep.mubr.f32.mxu0 %v465_v5  ;;  %p449_p4 = pnand %p448_p3, %p442_p0 }
   0xf   :  { %189 = vperm.xlu0 %439, %v175_v17  }
  0x10   :  { %409 = vmatmul.mubr.msk.f32.gmra.mrb[4].mxu0 %vm59_vm0, %v33_v16  ;;  %194 = vperm.xlu1 %440, %v176_v18  }
  0x11   :  { %154 = vmatprep.mubr.f32.mxu0 %v465_v5 }
  0x13   :  { %311 = vperm.xlu0 %439, %v308_v20  }
  0x14   :  { %410 = vmatmul.mubr.msk.f32.gmra.mrb[6].mxu0 %vm59_vm0, %v34_v19 }
  0x15   :  { %381 = vmatprep.mubr.f32.mxu0 %v465_v5 }
  0x82   :  { %v42_v21 = vpop.permute.xlu0 %41 }
  0x83   :  { %v52_v30 = vpop.permute.xlu1 %51 }
  0x86   :  { %v47_v25 = vpop.permute.xlu0 %46 }
  0x87   :  { %v57_v41 = vpop.permute.xlu1 %56 }
  0x8a   :  { %v180_v59 = vpop.permute.xlu0 %179 }
  0x8b   :  { %v185_v61 = vpop.permute.xlu1 %184 }
  0x8e   :  { %v190_v10 = vpop.permute.xlu0 %189 }
  0x8f   :  { %v195_v13 = vpop.permute.xlu1 %194 }
  0xdb   :  { %v138_v22 = vpop.f32.mrb[0].mxu0 }
  0xdc   :  { %v140_v23 = vpop.f32.mrb[1].mxu0  ;;  %v139_v24 = vadd.f32 %v138_v22, %v42_v21 }
  0xdd   :  { %v141_v26 = vadd.f32 %v140_v23, %v42_v21 }
  0xde   :  { %v161_v32 = vmax.f32 %v139_v24, 0.0 }
  0xdf   :  { %v144_v27 = vpop.f32.mrb[2].mxu0  ;;  %v162_v34 = vmax.f32 %v141_v26, 0.0  ;;  %v312_v26 = vpop.permute.xlu0 %311 }
  0xe0   :  { %v145_v28 = vadd.f32 %v144_v27, %v47_v25  ;;  %v146_v29 = vpop.f32.mrb[3].mxu0 }
  0xe1   :  { %v147_v31 = vadd.f32 %v146_v29, %v47_v25  ;;  %v307_v25 = vld [vmem:[%s609_s5] sm:$0xf] }
  0xe2   :  { %v163_v33 = vmax.f32 %v145_v28, 0.0 }
  0xe3   :  { %v164_v35 = vmax.f32 %v147_v31, 0.0  ;;  %v150_v36 = vpop.f32.mrb[4].mxu0 }
  0xe4   :  { %v152_v37 = vpop.f32.mrb[5].mxu0  ;;  %v422_v38 = vpack.c.bf16 %v163_v33, %v161_v32  ;;  %v151_v40 = vadd.f32 %v150_v36, %v52_v30 }
  0xe5   :  { %v420_v39 = vpack.c.bf16 %v164_v35, %v162_v34  ;;  %v153_v42 = vadd.f32 %v152_v37, %v52_v30 }
  0xe6   :  { %v165_v47 = vmax.f32 %v151_v40, 0.0 }
  0xe7   :  { %v156_v43 = vpop.f32.mrb[6].mxu0  ;;  %421 = vmatprep.subr.bf16.mxu1 %v420_v39  ;;  %v166_v49 = vmax.f32 %v153_v42, 0.0 }
  0xe8   :  { %v157_v44 = vadd.f32 %v156_v43, %v57_v41  ;;  %v158_v45 = vpop.f32.mrb[7].mxu0  ;;  %423 = vmatpush1.bf16.msra.mxu1 %v422_v38 }
  0xe9   :  { %v159_v46 = vadd.f32 %v158_v45, %v57_v41 }
  0xea   :  { %v167_v48 = vmax.f32 %v157_v44, 0.0 }
  0xeb   :  { %v168_v50 = vmax.f32 %v159_v46, 0.0 }
  0xec   :  { %v426_v51 = vpack.c.bf16 %v167_v48, %v165_v47 }
  0xed   :  { %v424_v52 = vpack.c.bf16 %v168_v50, %v166_v49 }
  0xef   :  { %425 = vmatprep.subr.bf16.mxu1 %v424_v52 }
  0xf0   :  { %427 = vmatpush1.bf16.msra.mxu1 %v426_v51 }
  0xf3   :  { %411 = vmatmul.mubr.msk.f32.vlgmr.msra.gmra.mrb[0].mxu1 %vm197_vm1, %v169_v53 }
  0xf4   :  { %280 = vmatprep.mubr.f32.mxu1 %v465_v5 }
  0xf7   :  { %412 = vmatmul.mubr.msk.f32.gmra.mrb[2].mxu1 %vm197_vm1, %v170_v54 }
  0xf8   :  { %286 = vmatprep.mubr.f32.mxu1 %v465_v5 }
  0xfb   :  { %413 = vmatmul.mubr.msk.f32.gmra.mrb[4].mxu1 %vm197_vm1, %v171_v55 }
  0xfc   :  { %292 = vmatprep.mubr.f32.mxu1 %v465_v5 }
  0xff   :  { %414 = vmatmul.mubr.msk.f32.gmra.mrb[6].mxu1 %vm197_vm1, %v172_v56 }
 0x1c6   :  { %v276_v57 = vpop.f32.mrb[0].mxu1 }
 0x1c7   :  { %v278_v58 = vpop.f32.mrb[1].mxu1  ;;  %v277_v60 = vadd.f32 %v276_v57, %v180_v59 }
 0x1c8   :  { %v279_v62 = vadd.f32 %v278_v58, %v180_v59 }
 0x1c9   :  { %v299_v3 = vmax.f32 %v277_v60, 0.0 }
 0x1ca   :  { %v282_v63 = vpop.f32.mrb[2].mxu1  ;;  %v300_v6 = vmax.f32 %v279_v62, 0.0 }
 0x1cb   :  { %v283_v0 = vadd.f32 %v282_v63, %v185_v61  ;;  %v284_v1 = vpop.f32.mrb[3].mxu1 }
 0x1cc   :  { %v285_v2 = vadd.f32 %v284_v1, %v185_v61 }
 0x1cd   :  { %v301_v4 = vmax.f32 %v283_v0, 0.0 }
 0x1ce   :  { %v302_v5 = vmax.f32 %v285_v2, 0.0  ;;  %v288_v7 = vpop.f32.mrb[4].mxu1 }
 0x1cf   :  { %v430_v8 = vpack.c.bf16 %v301_v4, %v299_v3  ;;  %v290_v9 = vpop.f32.mrb[5].mxu1  ;;  %v289_v12 = vadd.f32 %v288_v7, %v190_v10 }
 0x1d0   :  { %v428_v11 = vpack.c.bf16 %v302_v5, %v300_v6  ;;  %v291_v14 = vadd.f32 %v290_v9, %v190_v10 }
 0x1d1   :  { %v303_v19 = vmax.f32 %v289_v12, 0.0 }
 0x1d2   :  { %v294_v15 = vpop.f32.mrb[6].mxu1  ;;  %429 = vmatprep.subr.bf16.mxu0 %v428_v11  ;;  %v304_v21 = vmax.f32 %v291_v14, 0.0 }
 0x1d3   :  { %v295_v16 = vadd.f32 %v294_v15, %v195_v13  ;;  %v296_v17 = vpop.f32.mrb[7].mxu1  ;;  %431 = vmatpush1.bf16.msra.mxu0 %v430_v8 }
 0x1d4   :  { %v297_v18 = vadd.f32 %v296_v17, %v195_v13 }
 0x1d5   :  { %v305_v20 = vmax.f32 %v295_v16, 0.0 }
 0x1d6   :  { %v306_v22 = vmax.f32 %v297_v18, 0.0 }
 0x1d7   :  { %v434_v23 = vpack.c.bf16 %v305_v20, %v303_v19 }
 0x1d8   :  { %v432_v24 = vpack.c.bf16 %v306_v22, %v304_v21 }
 0x1da   :  { %433 = vmatprep.subr.bf16.mxu0 %v432_v24 }
 0x1db   :  { %435 = vmatpush1.bf16.msra.mxu0 %v434_v23 }
 0x1de   :  { %415 = vmatmul.mubr.msk.f32.vlgmr.msra.gmra.mrb[8].mxu0 %vm197_vm1, %v307_v25 }
 0x2b1   :  { %v383_v27 = vpop.f32.mrb[8].mxu0 }
 0x2b2   :  { %v384_v28 = vadd.f32 %v383_v27, %v312_v26  ;;  %v385_v29 = vpop.f32.mrb[9].mxu0 }
 0x2b3   :  { %v386_v30 = vadd.f32 %v385_v29, %v312_v26 }
 0x2b5   :  { %v390_v31 = vcombine.low %v384_v28, %v386_v30 }
 0x2b7   :  { %392 = vst [vmem:[#allocation2] sm:$0xff] %v390_v31 }
 0x2b8   :  { %452 = shalt.err (!%p449_p4)
}
 0x2b9   :  { %s453_s19 = scalar_lea.hbm %s611_s7, 128 }
 0x2ba   :  { %p454_p5 = scmp.ne.s32.totalorder %s611_s7, %s453_s19  ;;  %p457_p6 = scmp.lt.u32.totalorder %s453_s19, %s611_s7 }
 0x2bc   :  { %p459_p7 = pnand %p457_p6, %p454_p5 }
 0x2be   :  { %462 = shalt.err (!%p459_p7)
}
 0x2bf   :  { %402 = dma.vmem_to_hbm [thread:$0]  %s400_s16, 128, %s611_s7, [#allocation3]  }
 0x2c0   :  { %463 = dma.done.wait [#allocation3], 128  }
 0x2c1   :  { %464 = vsyncadd [#allocation3], 4294967168 }
 0x2c2   :  { %406 = vsyncpa [#allocation3], 1 }

</bundles_post_ra>
